<compile_context>
chip_gen: v7x
topology: tpu7x:2x2x1
jax: 0.10.0
libtpu: 0.0.40
codegen_flags: <defaults>
</compile_context>

<pallas_src>
import jax
import jax.numpy as jnp
from jax.experimental import pallas as pl
from jax.experimental.pallas import tpu as pltpu

KH = KW = 3
BN_EPS = 1e-5


# ------------------------------- fused kernel -------------------------------


def _basic_block_kernel(x_ref, w1_ref, s1_ref, b1_ref, w2_ref, s2_ref, b2_ref,
                        o_ref, xp_s, hp_s):
    """Fused BasicBlock forward for one batch element, W-folded lane layout.

    x_ref : (H, W*Cin)            bf16  input slab (also the residual identity)
    w*_ref: (3, W*Cin, W*Cout)    bf16  banded conv weights, one matrix per kh
                                        (kw shifts + W-boundary zeros baked in)
    s*/b* : (1, W*C)              f32   folded BatchNorm scale / shift (tiled
                                        over W to match the folded lane layout)
    o_ref : (H, W*Cout)           f32   output slab
    xp_s  : (H+2, W*Cin)          bf16  VMEM scratch: input with 1-row halo
    hp_s  : (H+2, W*Cmid)         bf16  VMEM scratch: intermediate with halo
    """
    H = o_ref.shape[0]

    def conv3x3_banded(pad_ref, w_ref):
        # out[y, :] = sum_kh pad[y + kh, :] @ W_kh ; bf16 operands, f32 acc.
        # Chained adjacent accumulation so Mosaic can accumulate in the MXU
        # result buffer on v7x instead of popping + VALU-adding each partial.
        acc = jnp.dot(pad_ref[0:H, :], w_ref[0],
                      preferred_element_type=jnp.float32)
        acc = acc + jnp.dot(pad_ref[1:H + 1, :], w_ref[1],
                            preferred_element_type=jnp.float32)
        acc = acc + jnp.dot(pad_ref[2:H + 2, :], w_ref[2],
                            preferred_element_type=jnp.float32)
        return acc

    # Zero only the 1-row halos (the interior rows [1:H+1] are fully
    # overwritten below every step — keep it that way or re-zero them too).
    zx = jnp.zeros((1, xp_s.shape[1]), xp_s.dtype)
    zh = jnp.zeros((1, hp_s.shape[1]), hp_s.dtype)
    xp_s[0:1, :] = zx
    xp_s[H + 1:H + 2, :] = zx
    hp_s[0:1, :] = zh
    hp_s[H + 1:H + 2, :] = zh

    # conv1 -> BN1 -> ReLU ; h stays resident in VMEM (bf16, cast once).
    xp_s[1:H + 1, :] = x_ref[...]
    h = conv3x3_banded(xp_s, w1_ref)
    h = jnp.maximum(h * s1_ref[...] + b1_ref[...], 0.0)
    hp_s[1:H + 1, :] = h.astype(hp_s.dtype)

    # conv2 -> BN2 -> + identity -> ReLU.
    y = conv3x3_banded(hp_s, w2_ref)
    y = y * s2_ref[...] + b2_ref[...] + x_ref[...].astype(jnp.float32)
    o_ref[...] = jnp.maximum(y, 0.0).astype(o_ref.dtype)


# ------------------------------ pallas_call glue -----------------------------


def _fold_bn(gamma, beta, mean, var):
    scale = gamma * jax.lax.rsqrt(var + BN_EPS)
    bias = beta - mean * scale
    return scale, bias                                  # (C,), (C,)


def _banded_conv_weights(w_oihw, W):
    """Torch (Cout, Cin, 3, 3) -> (3, W*Cin, W*Cout) banded matrices.

    For each kh, the 3 kw taps are placed on block off-diagonals of a
    (W, W)-block matrix (block = (Cin, Cout) tap), so one matmul against the
    W-folded activation slab performs the whole kw sum, with the W-direction
    zero padding handled by band truncation.
    """
    w_hwio = jnp.transpose(w_oihw, (2, 3, 1, 0))        # (kh, kw, Cin, Cout)
    ci, co = w_hwio.shape[2], w_hwio.shape[3]
    mats = []
    for r in range(KH):
        m = jnp.zeros((W * ci, W * co), jnp.float32)
        for c in range(KW):
            dx = c - 1
            shift = jnp.eye(W, W, k=-dx, dtype=jnp.float32)   # S[x+dx, x] = 1
            m = m + jnp.kron(shift, w_hwio[r, c].astype(jnp.float32))
        mats.append(m)
    return jnp.stack(mats, 0)


@jax.jit
def basic_block_forward(x_nchw, params):
    """BasicBlock forward.  x_nchw: (N, C, H, W) f32 -> (N, C, H, W) f32."""
    N, Cin, H, W = x_nchw.shape

    # NCHW -> NHWC -> W-folded (N, H, W*C) lane-dense slabs, bf16 operands.
    x = jnp.transpose(x_nchw, (0, 2, 3, 1)).reshape(N, H, W * Cin)
    x = x.astype(jnp.bfloat16)

    w1 = _banded_conv_weights(params["conv1_w"], W).astype(jnp.bfloat16)
    w2 = _banded_conv_weights(params["conv2_w"], W).astype(jnp.bfloat16)
    Cmid = params["conv1_w"].shape[0]
    Cout = params["conv2_w"].shape[0]

    s1, b1 = _fold_bn(params["bn1_gamma"], params["bn1_beta"],
                      params["bn1_mean"], params["bn1_var"])
    s2, b2 = _fold_bn(params["bn2_gamma"], params["bn2_beta"],
                      params["bn2_mean"], params["bn2_var"])
    # Tile per-channel BN params over W to match the folded (W*C) lane layout.
    s1f = jnp.tile(s1, W).reshape(1, W * Cmid)
    b1f = jnp.tile(b1, W).reshape(1, W * Cmid)
    s2f = jnp.tile(s2, W).reshape(1, W * Cout)
    b2f = jnp.tile(b2, W).reshape(1, W * Cout)

    out = pl.pallas_call(
        _basic_block_kernel,
        out_shape=jax.ShapeDtypeStruct((N, H, W * Cout), jnp.float32),
        grid=(N,),
        in_specs=[
            pl.BlockSpec((None, H, W * Cin), lambda n: (n, 0, 0)),
            pl.BlockSpec((KH, W * Cin, W * Cmid), lambda n: (0, 0, 0)),
            pl.BlockSpec((1, W * Cmid), lambda n: (0, 0)),
            pl.BlockSpec((1, W * Cmid), lambda n: (0, 0)),
            pl.BlockSpec((KH, W * Cmid, W * Cout), lambda n: (0, 0, 0)),
            pl.BlockSpec((1, W * Cout), lambda n: (0, 0)),
            pl.BlockSpec((1, W * Cout), lambda n: (0, 0)),
        ],
        out_specs=pl.BlockSpec((None, H, W * Cout), lambda n: (n, 0, 0)),
        scratch_shapes=[
            pltpu.VMEM((H + 2, W * Cin), jnp.bfloat16),
            pltpu.VMEM((H + 2, W * Cmid), jnp.bfloat16),
        ],
        compiler_params=pltpu.CompilerParams(
            dimension_semantics=("parallel",)),
    )(x, w1, s1f, b1f, w2, s2f, b2f)

    out = out.reshape(N, H, W, Cout)
    return jnp.transpose(out, (0, 3, 1, 2))             # NHWC -> NCHW


# --------------------------- reference (plain JAX) ---------------------------


def _reference(x_nchw, params):
    # Mirrors the kernel's precision: bf16 conv operands, f32 accumulation,
    # f32 BN / ReLU / residual epilogue.
    x = jnp.transpose(x_nchw, (0, 2, 3, 1)).astype(jnp.bfloat16)
    x32 = x.astype(jnp.float32)

    def conv(h, w_oihw):
        w = jnp.transpose(w_oihw, (2, 3, 1, 0)).astype(jnp.bfloat16)  # HWIO
        return jax.lax.conv_general_dilated(
            h.astype(jnp.bfloat16), w, window_strides=(1, 1), padding="SAME",
            dimension_numbers=("NHWC", "HWIO", "NHWC"),
            preferred_element_type=jnp.float32)

    s1, b1 = _fold_bn(params["bn1_gamma"], params["bn1_beta"],
                      params["bn1_mean"], params["bn1_var"])
    s2, b2 = _fold_bn(params["bn2_gamma"], params["bn2_beta"],
                      params["bn2_mean"], params["bn2_var"])

    h = jnp.maximum(conv(x32, params["conv1_w"]) * s1 + b1, 0.0)
    out = conv(h, params["conv2_w"]) * s2 + b2 + x32
    out = jnp.maximum(out, 0.0)
    return jnp.transpose(out, (0, 3, 1, 2))


# ------------------------------------ main -----------------------------------


if __name__ == "__main__":
    # inplanes = planes = 8, stride = 1, W*C = 128 (lane-dense folded layout);
    # N = 4 so each v7x TensorCore gets >= 2 pipeline steps.
    N, C, H, W = 4, 8, 16, 16
    key = jax.random.PRNGKey(0)
    ks = jax.random.split(key, 11)

    params = {
        "conv1_w": 0.1 * jax.random.normal(ks[0], (C, C, 3, 3), jnp.float32),
        "conv2_w": 0.1 * jax.random.normal(ks[1], (C, C, 3, 3), jnp.float32),
        "bn1_gamma": 1.0 + 0.1 * jax.random.normal(ks[2], (C,), jnp.float32),
        "bn1_beta": 0.1 * jax.random.normal(ks[3], (C,), jnp.float32),
        "bn1_mean": 0.1 * jax.random.normal(ks[4], (C,), jnp.float32),
        "bn1_var": jnp.abs(jax.random.normal(ks[5], (C,), jnp.float32)) + 0.5,
        "bn2_gamma": 1.0 + 0.1 * jax.random.normal(ks[6], (C,), jnp.float32),
        "bn2_beta": 0.1 * jax.random.normal(ks[7], (C,), jnp.float32),
        "bn2_mean": 0.1 * jax.random.normal(ks[8], (C,), jnp.float32),
        "bn2_var": jnp.abs(jax.random.normal(ks[9], (C,), jnp.float32)) + 0.5,
    }
    x = jax.random.normal(ks[10], (N, C, H, W), jnp.float32)

    out = basic_block_forward(x, params)
    out = jax.block_until_ready(out)

    ref = _reference(x, params)
    assert out.shape == (N, C, H, W) and out.dtype == jnp.float32
    # NOTE: bf16 conv operands (mirrored in _reference) imply ~1e-2-level
    # deviation from a pure-f32 PyTorch BasicBlock; keep activations f32 in
    # the kernel if bit-closer parity is ever required.
    assert jnp.max(jnp.abs(out - ref)) < 1e-2, "mismatch vs reference"

    print("KERNEL_OK")
</pallas_src>

<mosaic_0001>
module attributes {stable_mosaic.version = 11 : i64} {
  func.func @_basic_block_kernel(%arg0: i32, %arg1: memref<1x16x128xbf16, #tpu.memory_space<vmem>>, %arg2: memref<3x128x128xbf16, #tpu.memory_space<vmem>>, %arg3: memref<1x128xf32, #tpu.memory_space<vmem>>, %arg4: memref<1x128xf32, #tpu.memory_space<vmem>>, %arg5: memref<3x128x128xbf16, #tpu.memory_space<vmem>>, %arg6: memref<1x128xf32, #tpu.memory_space<vmem>>, %arg7: memref<1x128xf32, #tpu.memory_space<vmem>>, %arg8: memref<1x16x128xf32, #tpu.memory_space<vmem>>, %arg9: memref<18x128xbf16, #tpu.memory_space<vmem>>, %arg10: memref<18x128xbf16, #tpu.memory_space<vmem>>) attributes {dimension_semantics = [#tpu.dimension_semantics<parallel>], iteration_bounds = array<i64: 4>, scalar_prefetch = 0 : i64, scratch_operands = 2 : i64, tpu.core_type = #tpu.core_type<tc>, window_params = [{transform_indices = @transform_0, window_bounds = array<i64: 1, 16, 128>}, {pipeline_mode = #tpu.pipeline_mode<synchronous>, transform_indices = @transform_1, window_bounds = array<i64: 3, 128, 128>}, {pipeline_mode = #tpu.pipeline_mode<synchronous>, transform_indices = @transform_2, window_bounds = array<i64: 1, 128>}, {pipeline_mode = #tpu.pipeline_mode<synchronous>, transform_indices = @transform_3, window_bounds = array<i64: 1, 128>}, {pipeline_mode = #tpu.pipeline_mode<synchronous>, transform_indices = @transform_4, window_bounds = array<i64: 3, 128, 128>}, {pipeline_mode = #tpu.pipeline_mode<synchronous>, transform_indices = @transform_5, window_bounds = array<i64: 1, 128>}, {pipeline_mode = #tpu.pipeline_mode<synchronous>, transform_indices = @transform_6, window_bounds = array<i64: 1, 128>}, {transform_indices = @transform_7, window_bounds = array<i64: 1, 16, 128>}]} {
    %cst = arith.constant 0.000000e+00 : bf16
    %0 = vector.broadcast %cst : bf16 to vector<1x128xbf16>
    %cst_0 = arith.constant 0.000000e+00 : bf16
    %1 = vector.broadcast %cst_0 : bf16 to vector<1x128xbf16>
    %c0 = arith.constant 0 : index
    %c0_1 = arith.constant 0 : index
    %2 = vector.load %arg9[%c0, %c0_1] : memref<18x128xbf16, #tpu.memory_space<vmem>>, vector<1x128xbf16>
    tpu.vector_store %arg9[%c0, %c0_1], %0 {strides = array<i32>} : memref<18x128xbf16, #tpu.memory_space<vmem>>, vector<1x128xbf16>,
    %c17 = arith.constant 17 : index
    %c0_2 = arith.constant 0 : index
    %3 = vector.load %arg9[%c17, %c0_2] : memref<18x128xbf16, #tpu.memory_space<vmem>>, vector<1x128xbf16>
    tpu.vector_store %arg9[%c17, %c0_2], %0 {strides = array<i32>} : memref<18x128xbf16, #tpu.memory_space<vmem>>, vector<1x128xbf16>,
    %c0_3 = arith.constant 0 : index
    %c0_4 = arith.constant 0 : index
    %4 = vector.load %arg10[%c0_3, %c0_4] : memref<18x128xbf16, #tpu.memory_space<vmem>>, vector<1x128xbf16>
    tpu.vector_store %arg10[%c0_3, %c0_4], %1 {strides = array<i32>} : memref<18x128xbf16, #tpu.memory_space<vmem>>, vector<1x128xbf16>,
    %c17_5 = arith.constant 17 : index
    %c0_6 = arith.constant 0 : index
    %5 = vector.load %arg10[%c17_5, %c0_6] : memref<18x128xbf16, #tpu.memory_space<vmem>>, vector<1x128xbf16>
    tpu.vector_store %arg10[%c17_5, %c0_6], %1 {strides = array<i32>} : memref<18x128xbf16, #tpu.memory_space<vmem>>, vector<1x128xbf16>,
    %c0_7 = arith.constant 0 : index
    %c0_8 = arith.constant 0 : index
    %c0_9 = arith.constant 0 : index
    %6 = vector.load %arg1[%c0_7, %c0_8, %c0_9] : memref<1x16x128xbf16, #tpu.memory_space<vmem>>, vector<1x16x128xbf16>
    %7 = vector.shape_cast %6 : vector<1x16x128xbf16> to vector<16x128xbf16>
    %c1 = arith.constant 1 : index
    %c0_10 = arith.constant 0 : index
    %8 = vector.load %arg9[%c1, %c0_10] : memref<18x128xbf16, #tpu.memory_space<vmem>>, vector<16x128xbf16>
    tpu.vector_store %arg9[%c1, %c0_10], %7 {strides = array<i32>} : memref<18x128xbf16, #tpu.memory_space<vmem>>, vector<16x128xbf16>,
    %c0_11 = arith.constant 0 : index
    %c0_12 = arith.constant 0 : index
    %9 = vector.load %arg9[%c0_11, %c0_12] : memref<18x128xbf16, #tpu.memory_space<vmem>>, vector<16x128xbf16>
    %c0_13 = arith.constant 0 : index
    %c0_14 = arith.constant 0 : index
    %c0_15 = arith.constant 0 : index
    %10 = vector.load %arg2[%c0_13, %c0_14, %c0_15] : memref<3x128x128xbf16, #tpu.memory_space<vmem>>, vector<1x128x128xbf16>
    %11 = vector.shape_cast %10 : vector<1x128x128xbf16> to vector<128x128xbf16>
    %cst_16 = arith.constant dense<0.000000e+00> : vector<16x128xf32>
    %12 = tpu.matmul %9, %11, %cst_16 {dimension_numbers = #tpu.dot_dimension_numbers<[1], [0], [0], [1], [0, 0, 1, 1], [], []>} : vector<16x128xbf16>, vector<128x128xbf16>, vector<16x128xf32> -> vector<16x128xf32>
    %c1_17 = arith.constant 1 : index
    %c0_18 = arith.constant 0 : index
    %13 = vector.load %arg9[%c1_17, %c0_18] : memref<18x128xbf16, #tpu.memory_space<vmem>>, vector<16x128xbf16>
    %c1_19 = arith.constant 1 : index
    %c0_20 = arith.constant 0 : index
    %c0_21 = arith.constant 0 : index
    %14 = vector.load %arg2[%c1_19, %c0_20, %c0_21] : memref<3x128x128xbf16, #tpu.memory_space<vmem>>, vector<1x128x128xbf16>
    %15 = vector.shape_cast %14 : vector<1x128x128xbf16> to vector<128x128xbf16>
    %cst_22 = arith.constant dense<0.000000e+00> : vector<16x128xf32>
    %16 = tpu.matmul %13, %15, %cst_22 {dimension_numbers = #tpu.dot_dimension_numbers<[1], [0], [0], [1], [0, 0, 1, 1], [], []>} : vector<16x128xbf16>, vector<128x128xbf16>, vector<16x128xf32> -> vector<16x128xf32>
    %17 = arith.addf %12, %16 : vector<16x128xf32>
    %c2 = arith.constant 2 : index
    %c0_23 = arith.constant 0 : index
    %18 = vector.load %arg9[%c2, %c0_23] : memref<18x128xbf16, #tpu.memory_space<vmem>>, vector<16x128xbf16>
    %c2_24 = arith.constant 2 : index
    %c0_25 = arith.constant 0 : index
    %c0_26 = arith.constant 0 : index
    %19 = vector.load %arg2[%c2_24, %c0_25, %c0_26] : memref<3x128x128xbf16, #tpu.memory_space<vmem>>, vector<1x128x128xbf16>
    %20 = vector.shape_cast %19 : vector<1x128x128xbf16> to vector<128x128xbf16>
    %cst_27 = arith.constant dense<0.000000e+00> : vector<16x128xf32>
    %21 = tpu.matmul %18, %20, %cst_27 {dimension_numbers = #tpu.dot_dimension_numbers<[1], [0], [0], [1], [0, 0, 1, 1], [], []>} : vector<16x128xbf16>, vector<128x128xbf16>, vector<16x128xf32> -> vector<16x128xf32>
    %22 = arith.addf %17, %21 : vector<16x128xf32>
    %c0_28 = arith.constant 0 : index
    %c0_29 = arith.constant 0 : index
    %23 = vector.load %arg3[%c0_28, %c0_29] : memref<1x128xf32, #tpu.memory_space<vmem>>, vector<1x128xf32>
    %24 = vector.broadcast %23 : vector<1x128xf32> to vector<16x128xf32>
    %25 = arith.mulf %22, %24 : vector<16x128xf32>
    %c0_30 = arith.constant 0 : index
    %c0_31 = arith.constant 0 : index
    %26 = vector.load %arg4[%c0_30, %c0_31] : memref<1x128xf32, #tpu.memory_space<vmem>>, vector<1x128xf32>
    %27 = vector.broadcast %26 : vector<1x128xf32> to vector<16x128xf32>
    %28 = arith.addf %25, %27 : vector<16x128xf32>
    %cst_32 = arith.constant 0.000000e+00 : f32
    %29 = vector.broadcast %cst_32 : f32 to vector<16x128xf32>
    %30 = arith.maximumf %28, %29 : vector<16x128xf32>
    %31 = arith.truncf %30 : vector<16x128xf32> to vector<16x128xbf16>
    %c1_33 = arith.constant 1 : index
    %c0_34 = arith.constant 0 : index
    %32 = vector.load %arg10[%c1_33, %c0_34] : memref<18x128xbf16, #tpu.memory_space<vmem>>, vector<16x128xbf16>
    tpu.vector_store %arg10[%c1_33, %c0_34], %31 {strides = array<i32>} : memref<18x128xbf16, #tpu.memory_space<vmem>>, vector<16x128xbf16>,
    %c0_35 = arith.constant 0 : index
    %c0_36 = arith.constant 0 : index
    %33 = vector.load %arg10[%c0_35, %c0_36] : memref<18x128xbf16, #tpu.memory_space<vmem>>, vector<16x128xbf16>
    %c0_37 = arith.constant 0 : index
    %c0_38 = arith.constant 0 : index
    %c0_39 = arith.constant 0 : index
    %34 = vector.load %arg5[%c0_37, %c0_38, %c0_39] : memref<3x128x128xbf16, #tpu.memory_space<vmem>>, vector<1x128x128xbf16>
    %35 = vector.shape_cast %34 : vector<1x128x128xbf16> to vector<128x128xbf16>
    %cst_40 = arith.constant dense<0.000000e+00> : vector<16x128xf32>
    %36 = tpu.matmul %33, %35, %cst_40 {dimension_numbers = #tpu.dot_dimension_numbers<[1], [0], [0], [1], [0, 0, 1, 1], [], []>} : vector<16x128xbf16>, vector<128x128xbf16>, vector<16x128xf32> -> vector<16x128xf32>
    %c1_41 = arith.constant 1 : index
    %c0_42 = arith.constant 0 : index
    %37 = vector.load %arg10[%c1_41, %c0_42] : memref<18x128xbf16, #tpu.memory_space<vmem>>, vector<16x128xbf16>
    %c1_43 = arith.constant 1 : index
    %c0_44 = arith.constant 0 : index
    %c0_45 = arith.constant 0 : index
    %38 = vector.load %arg5[%c1_43, %c0_44, %c0_45] : memref<3x128x128xbf16, #tpu.memory_space<vmem>>, vector<1x128x128xbf16>
    %39 = vector.shape_cast %38 : vector<1x128x128xbf16> to vector<128x128xbf16>
    %cst_46 = arith.constant dense<0.000000e+00> : vector<16x128xf32>
    %40 = tpu.matmul %37, %39, %cst_46 {dimension_numbers = #tpu.dot_dimension_numbers<[1], [0], [0], [1], [0, 0, 1, 1], [], []>} : vector<16x128xbf16>, vector<128x128xbf16>, vector<16x128xf32> -> vector<16x128xf32>
    %41 = arith.addf %36, %40 : vector<16x128xf32>
    %c2_47 = arith.constant 2 : index
    %c0_48 = arith.constant 0 : index
    %42 = vector.load %arg10[%c2_47, %c0_48] : memref<18x128xbf16, #tpu.memory_space<vmem>>, vector<16x128xbf16>
    %c2_49 = arith.constant 2 : index
    %c0_50 = arith.constant 0 : index
    %c0_51 = arith.constant 0 : index
    %43 = vector.load %arg5[%c2_49, %c0_50, %c0_51] : memref<3x128x128xbf16, #tpu.memory_space<vmem>>, vector<1x128x128xbf16>
    %44 = vector.shape_cast %43 : vector<1x128x128xbf16> to vector<128x128xbf16>
    %cst_52 = arith.constant dense<0.000000e+00> : vector<16x128xf32>
    %45 = tpu.matmul %42, %44, %cst_52 {dimension_numbers = #tpu.dot_dimension_numbers<[1], [0], [0], [1], [0, 0, 1, 1], [], []>} : vector<16x128xbf16>, vector<128x128xbf16>, vector<16x128xf32> -> vector<16x128xf32>
    %46 = arith.addf %41, %45 : vector<16x128xf32>
    %c0_53 = arith.constant 0 : index
    %c0_54 = arith.constant 0 : index
    %47 = vector.load %arg6[%c0_53, %c0_54] : memref<1x128xf32, #tpu.memory_space<vmem>>, vector<1x128xf32>
    %48 = vector.broadcast %47 : vector<1x128xf32> to vector<16x128xf32>
    %49 = arith.mulf %46, %48 : vector<16x128xf32>
    %c0_55 = arith.constant 0 : index
    %c0_56 = arith.constant 0 : index
    %50 = vector.load %arg7[%c0_55, %c0_56] : memref<1x128xf32, #tpu.memory_space<vmem>>, vector<1x128xf32>
    %51 = vector.broadcast %50 : vector<1x128xf32> to vector<16x128xf32>
    %52 = arith.addf %49, %51 : vector<16x128xf32>
    %c0_57 = arith.constant 0 : index
    %c0_58 = arith.constant 0 : index
    %c0_59 = arith.constant 0 : index
    %53 = vector.load %arg1[%c0_57, %c0_58, %c0_59] : memref<1x16x128xbf16, #tpu.memory_space<vmem>>, vector<1x16x128xbf16>
    %54 = vector.shape_cast %53 : vector<1x16x128xbf16> to vector<16x128xbf16>
    %55 = arith.extf %54 : vector<16x128xbf16> to vector<16x128xf32>
    %56 = arith.addf %52, %55 : vector<16x128xf32>
    %cst_60 = arith.constant 0.000000e+00 : f32
    %57 = vector.broadcast %cst_60 : f32 to vector<16x128xf32>
    %58 = arith.maximumf %56, %57 : vector<16x128xf32>
    %c0_61 = arith.constant 0 : index
    %c0_62 = arith.constant 0 : index
    %c0_63 = arith.constant 0 : index
    %59 = vector.load %arg8[%c0_61, %c0_62, %c0_63] : memref<1x16x128xf32, #tpu.memory_space<vmem>>, vector<1x16x128xf32>
    %60 = vector.shape_cast %59 : vector<1x16x128xf32> to vector<16x128xf32>
    %61 = vector.shape_cast %58 : vector<16x128xf32> to vector<1x16x128xf32>
    tpu.vector_store %arg8[%c0_61, %c0_62, %c0_63], %61 {strides = array<i32>} : memref<1x16x128xf32, #tpu.memory_space<vmem>>, vector<1x16x128xf32>,
    return
  }
  func.func @transform_0(%arg0: i32) -> (i32, i32, i32) {
    %c0_i32 = arith.constant 0 : i32
    %c0_i32_0 = arith.constant 0 : i32
    %c0_i32_1 = arith.constant 0 : i32
    return %arg0, %c0_i32, %c0_i32_0 : i32, i32, i32
  }
  func.func @transform_1(%arg0: i32) -> (i32, i32, i32) {
    %c0_i32 = arith.constant 0 : i32
    %c0_i32_0 = arith.constant 0 : i32
    %c0_i32_1 = arith.constant 0 : i32
    %c0_i32_2 = arith.constant 0 : i32
    return %c0_i32, %c0_i32_0, %c0_i32_1 : i32, i32, i32
  }
  func.func @transform_2(%arg0: i32) -> (i32, i32) {
    %c0_i32 = arith.constant 0 : i32
    %c0_i32_0 = arith.constant 0 : i32
    %c0_i32_1 = arith.constant 0 : i32
    return %c0_i32, %c0_i32_0 : i32, i32
  }
  func.func @transform_3(%arg0: i32) -> (i32, i32) {
    %c0_i32 = arith.constant 0 : i32
    %c0_i32_0 = arith.constant 0 : i32
    %c0_i32_1 = arith.constant 0 : i32
    return %c0_i32, %c0_i32_0 : i32, i32
  }
  func.func @transform_4(%arg0: i32) -> (i32, i32, i32) {
    %c0_i32 = arith.constant 0 : i32
    %c0_i32_0 = arith.constant 0 : i32
    %c0_i32_1 = arith.constant 0 : i32
    %c0_i32_2 = arith.constant 0 : i32
    return %c0_i32, %c0_i32_0, %c0_i32_1 : i32, i32, i32
  }
  func.func @transform_5(%arg0: i32) -> (i32, i32) {
    %c0_i32 = arith.constant 0 : i32
    %c0_i32_0 = arith.constant 0 : i32
    %c0_i32_1 = arith.constant 0 : i32
    return %c0_i32, %c0_i32_0 : i32, i32
  }
  func.func @transform_6(%arg0: i32) -> (i32, i32) {
    %c0_i32 = arith.constant 0 : i32
    %c0_i32_0 = arith.constant 0 : i32
    %c0_i32_1 = arith.constant 0 : i32
    return %c0_i32, %c0_i32_0 : i32, i32
  }
  func.func @transform_7(%arg0: i32) -> (i32, i32, i32) {
    %c0_i32 = arith.constant 0 : i32
    %c0_i32_0 = arith.constant 0 : i32
    %c0_i32_1 = arith.constant 0 : i32
    return %arg0, %c0_i32, %c0_i32_0 : i32, i32, i32
  }
}

</mosaic_0001>

<bundles_post_ra>
// kernel: tile.23
= control target key start
LH: loop header
LB: loop body
LE: loop exit
PB: predicated region body
PF: predicated region fallthrough
CT: control target
= control target key end

     0   :  { %s28_s0 = inlined_call_operand.vmem [shape: f32[8], index: 0, kind: input, shape index: {}]   ;;  %s29_s1 = inlined_call_operand.vmem [shape: f32[16,8], index: 1, kind: output, shape index: {}]  }
   0x1   :  { %v4_v0 = vld [vmem:[%s28_s0] ss:$0 sm:$0xff] }
   0x2   :  { %5 = vst [vmem:[%s29_s1] sm:$0xff] %v4_v0  ;;  %8 = vst [vmem:[%s29_s1 + $0x8] sm:$0xff] %v4_v0 }

// kernel: tile.24
= control target key start
LH: loop header
LB: loop body
LE: loop exit
PB: predicated region body
PF: predicated region fallthrough
CT: control target
= control target key end

     0   :  { %s131_s10 = smov 120   ;;  %s132_s11 = smov 104   ;;  %vm3_vm0 = vcmask 64512   ;;  %vm9_vm1 = vcmask 1048512   ;;  %vm15_vm2 = vcmask 982912   ;;  %vm21_vm3 = vcmask 917312   ;;  %s207_s0 = inlined_call_operand.vmem [shape: f32[16,8], index: 0, kind: input, shape index: {}]   ;;  %s208_s1 = inlined_call_operand.vmem [shape: f32[1,128], index: 1, kind: output, shape index: {}]  }
   0x1   :  { %v101_v0 = vld [vmem:[%s207_s0 + $0xf] sm:$0x1]   ;;  %v103_v1 = vld [vmem:[%s207_s0 + $0xd] sm:$0x1]   ;;  %v102_v2 = vld [vmem:[%s207_s0 + $0xe] sm:$0x1]  }
   0x2   :  { %7 = vrot.lane.b32.xlu0 %v101_v0, %s131_s10  ;;  %19 = vrot.lane.b32.xlu1 %v103_v1, %s132_s11  ;;  %v104_v3 = vld [vmem:[%s207_s0 + $0xc] sm:$0x1]   ;;  %s133_s16 = smov 112   ;;  %s134_s17 = smov 96   ;;  %v105_v4 = vld [vmem:[%s207_s0 + $0xb] sm:$0x1]  }
   0x3   :  { %v106_v5 = vld [vmem:[%s207_s0 + $0xa] sm:$0x1]   ;;  %v2_v6 = vld [vmem:[%s207_s0] sm:$0x1]   ;;  %s135_s24 = smov 88   ;;  %s136_s25 = smov 80  }
   0x4   :  { %4 = vst.msk [vmem:[#allocation0] sm:$0x1] %vm3_vm0, %v2_v6   ;;  %v107_v7 = vld [vmem:[%s207_s0 + $0x9] sm:$0x1]   ;;  %v108_v8 = vld [vmem:[%s207_s0 + $0x8] sm:$0x1]  }
   0x5   :  { %s137_s30 = smov 72   ;;  %s138_s2 = smov 64   ;;  %v109_v9 = vld [vmem:[%s207_s0 + $0x7] sm:$0x1]   ;;  %v110_v10 = vld [vmem:[%s207_s0 + $0x6] sm:$0x1]  }
   0x6   :  { %13 = vrot.lane.b32.xlu0 %v102_v2, %s133_s16  ;;  %25 = vrot.lane.b32.xlu1 %v104_v3, %s134_s17  ;;  %s139_s7 = smov 56   ;;  %s140_s8 = smov 48   ;;  %v111_v11 = vld [vmem:[%s207_s0 + $0x5] sm:$0x1]   ;;  %v112_v12 = vld [vmem:[%s207_s0 + $0x4] sm:$0x1]  }
   0x7   :  { %s141_s13 = smov 40   ;;  %s142_s14 = smov 32   ;;  %v113_v13 = vld [vmem:[%s207_s0 + $0x3] sm:$0x1]   ;;  %v114_v14 = vld [vmem:[%s207_s0 + $0x2] sm:$0x1]  }
   0x8   :  { %s143_s19 = smov 24   ;;  %s144_s20 = smov 16   ;;  %v115_v15 = vld [vmem:[%s207_s0 + $0x1] sm:$0x1]   ;;  %vm27_vm4 = vcmask 851712   ;;  %vm33_vm5 = vcmask 786112  }
   0x9   :  { %s145_s0 = smov 8   ;;  %vm39_vm6 = vcmask 720512   ;;  %vm45_vm7 = vcmask 654912   ;;  %vm51_vm8 = vcmask 589312   ;;  %vm57_vm9 = vcmask 523712  }
   0xa   :  { %31 = vrot.lane.b32.xlu0 %v105_v4, %s135_s24  ;;  %37 = vrot.lane.b32.xlu1 %v106_v5, %s136_s25  ;;  %vm63_vm10 = vcmask 458112   ;;  %vm69_vm11 = vcmask 392512   ;;  %vm75_vm12 = vcmask 326912   ;;  %vm81_vm13 = vcmask 261312  }
   0xb   :  { %vm87_vm14 = vcmask 195712   ;;  %vm93_vm15 = vcmask 130112  }
   0xe   :  { %43 = vrot.lane.b32.xlu0 %v107_v7, %s137_s30  ;;  %49 = vrot.lane.b32.xlu1 %v108_v8, %s138_s2 }
  0x12   :  { %55 = vrot.lane.b32.xlu0 %v109_v9, %s139_s7  ;;  %61 = vrot.lane.b32.xlu1 %v110_v10, %s140_s8 }
  0x16   :  { %67 = vrot.lane.b32.xlu0 %v111_v11, %s141_s13  ;;  %73 = vrot.lane.b32.xlu1 %v112_v12, %s142_s14 }
  0x1a   :  { %79 = vrot.lane.b32.xlu0 %v113_v13, %s143_s19  ;;  %85 = vrot.lane.b32.xlu1 %v114_v14, %s144_s20 }
  0x1e   :  { %91 = vrot.lane.b32.xlu0 %v115_v15, %s145_s0 }
  0x74   :  { %v8_v16 = vpop.permute.xlu0 %7   ;;  %v20_v17 = vpop.permute.xlu1 %19  }
  0x75   :  { %10 = vst.msk [vmem:[#allocation0] sm:$0x1] %vm9_vm1, %v8_v16  }
  0x78   :  { %v14_v18 = vpop.permute.xlu0 %13   ;;  %v26_v19 = vpop.permute.xlu1 %25  }
  0x79   :  { %16 = vst.msk [vmem:[#allocation0] sm:$0x1] %vm15_vm2, %v14_v18  }
  0x7a   :  { %22 = vst.msk [vmem:[#allocation0] sm:$0x1] %vm21_vm3, %v20_v17  }
  0x7b   :  { %28 = vst.msk [vmem:[#allocation0] sm:$0x1] %vm27_vm4, %v26_v19  }
  0x7c   :  { %v32_v20 = vpop.permute.xlu0 %31   ;;  %v38_v21 = vpop.permute.xlu1 %37  }
  0x7d   :  { %34 = vst.msk [vmem:[#allocation0] sm:$0x1] %vm33_vm5, %v32_v20  }
  0x7e   :  { %40 = vst.msk [vmem:[#allocation0] sm:$0x1] %vm39_vm6, %v38_v21  }
  0x80   :  { %v44_v22 = vpop.permute.xlu0 %43   ;;  %v50_v23 = vpop.permute.xlu1 %49  }
  0x81   :  { %46 = vst.msk [vmem:[#allocation0] sm:$0x1] %vm45_vm7, %v44_v22  }
  0x82   :  { %52 = vst.msk [vmem:[#allocation0] sm:$0x1] %vm51_vm8, %v50_v23  }
  0x84   :  { %v56_v24 = vpop.permute.xlu0 %55   ;;  %v62_v25 = vpop.permute.xlu1 %61  }
  0x85   :  { %58 = vst.msk [vmem:[#allocation0] sm:$0x1] %vm57_vm9, %v56_v24  }
  0x86   :  { %64 = vst.msk [vmem:[#allocation0] sm:$0x1] %vm63_vm10, %v62_v25  }
  0x88   :  { %v68_v26 = vpop.permute.xlu0 %67   ;;  %v74_v27 = vpop.permute.xlu1 %73  }
  0x89   :  { %70 = vst.msk [vmem:[#allocation0] sm:$0x1] %vm69_vm11, %v68_v26  }
  0x8a   :  { %76 = vst.msk [vmem:[#allocation0] sm:$0x1] %vm75_vm12, %v74_v27  }
  0x8c   :  { %v80_v28 = vpop.permute.xlu0 %79   ;;  %v86_v29 = vpop.permute.xlu1 %85  }
  0x8d   :  { %82 = vst.msk [vmem:[#allocation0] sm:$0x1] %vm81_vm13, %v80_v28  }
  0x8e   :  { %88 = vst.msk [vmem:[#allocation0] sm:$0x1] %vm87_vm14, %v86_v29  }
  0x90   :  { %v92_v30 = vpop.permute.xlu0 %91  }
  0x91   :  { %94 = vst.msk [vmem:[#allocation0] sm:$0x1] %vm93_vm15, %v92_v30  }
  0x98   :  { %v98_v31 = vld [vmem:[#allocation0] sm:$0x1] }
  0x99   :  { %100 = vst [vmem:[%s208_s1] sm:$0x1] %v98_v31 }

// kernel: basic_block_forward.1
= control target key start
LH: loop header
LB: loop body
LE: loop exit
PB: predicated region body
PF: predicated region fallthrough
CT: control target
= control target key end

     0   :  { %s1619_s24 = smov 0   ;;  %s1905_s0 = inlined_call_operand.vmem [shape: bf16[4,16,128], index: 0, kind: input, shape index: {}]   ;;  %s1906_s1 = inlined_call_operand.vmem [shape: bf16[3,128,128], index: 1, kind: input, shape index: {}]   ;;  %s1907_s2 = inlined_call_operand.vmem [shape: f32[1,128], index: 2, kind: input, shape index: {}]   ;;  %s1908_s3 = inlined_call_operand.vmem [shape: f32[1,128], index: 3, kind: input, shape index: {}]   ;;  %s1909_s4 = inlined_call_operand.vmem [shape: bf16[3,128,128], index: 4, kind: input, shape index: {}]   ;;  %s1910_s5 = inlined_call_operand.vmem [shape: f32[1,128], index: 5, kind: input, shape index: {}]   ;;  %s1911_s6 = inlined_call_operand.vmem [shape: f32[1,128], index: 6, kind: input, shape index: {}]   ;;  %s1912_s7 = inlined_call_operand.vmem [shape: f32[4,16,128], index: 7, kind: output, shape index: {}]  }
   0x1 LB: > { %s1172_s25 = sadd.s32 4294967295, %s1575_s24   ;;  %p1176_p0 = scmp.ge.s32.totalorder %s1575_s24, 1  ;;  %s1575_s24 = sphi %s1619_s24, %s17_s24  }
   0x2   : > { %p237_p1 = scmp.lt.s32.totalorder %s1575_s24, 5 }
   0x4   : > { %p238_p2 = pnand %p1176_p0, %p237_p1 }
   0x5   : > { %v1515_v0 = vld [vmem:[%s1906_s1 + $0x40] sm:$0xff] (!%p238_p2)   ;;  %v1577_v1 = vmov (!%p238_p2), 0.0   ;;  %v1516_v2 = vld [vmem:[%s1906_s1 + $0x48] sm:$0xff] (!%p238_p2)   ;;  %vm1578_vm0 = vmmov (!%p238_p2), 0   ;;  %p269_p3 = scmp.lt.s32.totalorder (!%p238_p2), %s1172_s25, 3  ;;  %v1517_v3 = vld [vmem:[%s1906_s1 + $0x50] sm:$0xff] (!%p238_p2)  }
   0x6   : > { %241 = sbr.rel (%p238_p2) target bundleno = 638 (0x27e), region = 48  ;;  %1369 = vmatprep.subr.bf16.mxu0 (!%p238_p2), %v1577_v1  ;;  %1429 = vmatprep.subr.bf16.mxu1 (!%p238_p2), %v1577_v1  ;;  %vm280_vm1 = vcmask (!%p238_p2), 1040384   ;;  %v1518_v4 = vld [vmem:[%s1906_s1 + $0x58] sm:$0xff] (!%p238_p2)   ;;  %vm281_vm2 = vsmask.f32 (!%p238_p2), 256  ;;  %vm321_vm7 = vcmask (!%p238_p2), 1043456  }
   0x7   : > { %1370 = vmatpush3.bf16.msra.mxu0 (!%p238_p2), %v1515_v0  ;;  %1385 = vmatprep.mubr.msk.bf16.mxu0 (!%p238_p2), %vm1578_vm0, %v1577_v1  ;;  %v283_v5 = vld [vmem:[#allocation2] sm:$0x1] (!%p238_p2)  ;;  %vm286_vm3 = vsmask.f32 (!%p238_p2), 7938  ;;  %vm1656_vm4 = vmand (!%p238_p2), %vm280_vm1, %vm281_vm2  ;;  %v288_v7 = vld [vmem:[#allocation2 + $0x8] sm:$0x1] (!%p238_p2) }
   0x8   : > { %1371 = vmatprep.subr.bf16.mxu0 (!%p238_p2), %v1577_v1  ;;  %1445 = vmatprep.mubr.msk.bf16.mxu1 (!%p238_p2), %vm1578_vm0, %v1577_v1  ;;  %v284_v9 = vsel (!%p238_p2), %vm1656_vm4, 0, %v283_v5  ;;  %vm1664_vm5 = vmand (!%p238_p2), %vm280_vm1, %vm286_vm3  ;;  %vm299_vm6 = vsmask.f32 (!%p238_p2), 4368  ;;  %v1519_v18 = vld [vmem:[%s1906_s1 + $0x60] sm:$0xff] (!%p238_p2)   ;;  %v1520_v27 = vld [vmem:[%s1906_s1 + $0x68] sm:$0xff] (!%p238_p2)   ;;  %vm588_vm11 = vcmask (!%p238_p2), 1046528  }
   0x9   : > { %285 = vst [vmem:[#allocation2] sm:$0x1] (!%p238_p2), %v284_v9  ;;  %v289_v13 = vsel (!%p238_p2), %vm1664_vm5, 0, %v288_v7  ;;  %vm1676_vm8 = vmor (!%p238_p2), %vm281_vm2, %vm299_vm6  ;;  %v1521_v32 = vld [vmem:[%s1906_s1 + $0x70] sm:$0xff] (!%p238_p2)   ;;  %v1522_v34 = vld [vmem:[%s1906_s1 + $0x78] sm:$0xff] (!%p238_p2)  }
   0xa   : > { %290 = vst [vmem:[#allocation2 + $0x8] sm:$0x1] (!%p238_p2), %v289_v13  ;;  %vm1682_vm9 = vmand (!%p238_p2), %vm321_vm7, %vm286_vm3  ;;  %vm374_vm10 = vsmask.f32 (!%p238_p2), 7424  ;;  %v291_v43 = vld [vmem:[#allocation3] sm:$0x1] (!%p238_p2) }
   0xb   : > { %1372 = vmatpush3.bf16.msra.mxu0 (!%p238_p2), %v1516_v2  ;;  %v292_v45 = vsel (!%p238_p2), %vm1656_vm4, 0, %v291_v43  ;;  %v1525_v48 = vld [vmem:[%s1906_s1] sm:$0xff] (!%p238_p2)   ;;  %v1526_v53 = vld [vmem:[%s1906_s1 + $0x8] sm:$0xff] (!%p238_p2)   ;;  %v1527_v54 = vld [vmem:[%s1906_s1 + $0x10] sm:$0xff] (!%p238_p2)  }
   0xc   : > { %1373 = vmatprep.subr.bf16.mxu0 (!%p238_p2), %v1577_v1  ;;  %293 = vst [vmem:[#allocation3] sm:$0x1] (!%p238_p2), %v292_v45  ;;  %v1528_v55 = vld [vmem:[%s1906_s1 + $0x18] sm:$0xff] (!%p238_p2)   ;;  %v1529_v56 = vld [vmem:[%s1906_s1 + $0x20] sm:$0xff] (!%p238_p2)   ;;  %v1530_v57 = vld [vmem:[%s1906_s1 + $0x28] sm:$0xff] (!%p238_p2)  }
   0xd   : > { %s1922_s25 = smov (!%p269_p3, %s1172_s25), 3  ;;  %v1531_v58 = vld [vmem:[%s1906_s1 + $0x30] sm:$0xff]   ;;  %v1532_v59 = vld [vmem:[%s1906_s1 + $0x38] sm:$0xff]   ;;  %v1533_v60 = vld [vmem:[%s1906_s1 + $0x80] sm:$0xff]  }
   0xe   : > { %s1307_s9 = sshll.u32 %s1922_s25, 3  ;;  %v1534_v61 = vld [vmem:[%s1906_s1 + $0x88] sm:$0xff]   ;;  %v1535_v62 = vld [vmem:[%s1906_s1 + $0x90] sm:$0xff]   ;;  %v1536_v63 = vld [vmem:[%s1906_s1 + $0x98] sm:$0xff]   ;;  %s1308_s10 = sshll.u32 %s1922_s25, 4 }
   0xf   : > { %s1650_s12 = scalar_lea.vmem %s1905_s0, %s1307_s9  ;;  %1374 = vmatpush3.bf16.msra.mxu0 %v1517_v3  ;;  %v1537_v0 = vld [vmem:[%s1906_s1 + $0xa0] sm:$0xff]   ;;  %v1538_v2 = vld [vmem:[%s1906_s1 + $0xa8] sm:$0xff]   ;;  %v1539_v3 = vld [vmem:[%s1906_s1 + $0xb0] sm:$0xff]  }
  0x10   : > { %v297_v8 = vld [vmem:[%s1650_s12] sm:$0xf]  ;;  %v298_v11 = vld [vmem:[%s1650_s12 + $0x4] sm:$0xf]  ;;  %1375 = vmatprep.subr.bf16.mxu0 %v1577_v1  ;;  %v1543_v7 = vld [vmem:[%s1909_s4 + $0x48] sm:$0xff]  }
  0x11   : > { %v302_v12 = vshrl.u32 %v297_v8, 16  ;;  %v305_v14 = vshll.u32 %v297_v8, 16  ;;  %v310_v15 = vshrl.u32 %v298_v11, 16  ;;  %v313_v16 = vshll.u32 %v298_v11, 16  ;;  %v323_v28 = vld [vmem:[#allocation2] sm:$0xf] }
  0x12   : > { %v327_v30 = vld [vmem:[#allocation2 + $0x8] sm:$0x1]  ;;  %v1542_v5 = vld [vmem:[%s1909_s4 + $0x40] sm:$0xff]   ;;  %v294_v8 = vld [vmem:[#allocation3 + $0x8] sm:$0x1] }
  0x13   : > { %v304_v17 = vrot.slane %v302_v12, 7  ;;  %v312_v19 = vrot.slane %v310_v15, 7  ;;  %1376 = vmatpush3.bf16.msra.mxu0 %v1518_v4  ;;  %v1540_v4 = vld [vmem:[%s1906_s1 + $0xb8] sm:$0xff]   ;;  %1430 = vmatpush3.bf16.msra.mxu1 %v1542_v5  ;;  %v295_v9 = vsel %vm1664_vm5, 0, %v294_v8  ;;  %v1544_v11 = vld [vmem:[%s1909_s4 + $0x50] sm:$0xff]   ;;  %v1546_v10 = vld [vmem:[%s1909_s4 + $0x60] sm:$0xff]  }
  0x14   : > { %1377 = vmatprep.subr.bf16.mxu0 %v1577_v1  ;;  %1431 = vmatprep.subr.bf16.mxu1 %v1577_v1  ;;  %296 = vst [vmem:[#allocation3 + $0x8] sm:$0x1] %v295_v9  ;;  %v1545_v12 = vld [vmem:[%s1909_s4 + $0x58] sm:$0xff]   ;;  %v1547_v13 = vld [vmem:[%s1909_s4 + $0x68] sm:$0xff]   ;;  %v1552_v6 = vld [vmem:[%s1909_s4] sm:$0xff]  }
  0x15   : > { %v308_v21 = vrot.slane %v304_v17, 4  ;;  %v307_v22 = vor.u32 %v305_v14, %v304_v17  ;;  %v315_v23 = vor.u32 %v313_v16, %v312_v19  ;;  %v317_v24 = vrot.slane %v312_v19, 4  ;;  %v1548_v14 = vld [vmem:[%s1909_s4 + $0x70] sm:$0xff]   ;;  %v1549_v15 = vld [vmem:[%s1909_s4 + $0x78] sm:$0xff]   ;;  %v1240_v16 = vld [vmem:[%s1907_s2] ss:$0 sm:$0xff] }
  0x16   : > { %v1560_v5 = vld [vmem:[%s1909_s4 + $0x80] sm:$0xff]   ;;  %v1562_v8 = vld [vmem:[%s1909_s4 + $0x90] sm:$0xff]   ;;  %v1563_v9 = vld [vmem:[%s1909_s4 + $0x98] sm:$0xff]  }
  0x17   : > { %v316_v26 = vsel %vm1676_vm8, %v308_v21, %v315_v23  ;;  %1378 = vmatpush3.bf16.msra.mxu0 %v1519_v18  ;;  %v324_v29 = vsel %vm1682_vm9, %v307_v22, %v323_v28  ;;  %v328_v31 = vsel %vm1656_vm4, %v317_v24, %v327_v30  ;;  %1432 = vmatpush3.bf16.msra.mxu1 %v1543_v7  ;;  %v1241_v18 = vld [vmem:[%s1908_s3] ss:$0 sm:$0xff]  ;;  %v1561_v7 = vld [vmem:[%s1909_s4 + $0x88] sm:$0xff]  }
  0x18   : > { %326 = vst [vmem:[#allocation2 + $0x4] sm:$0xf] %v316_v26  ;;  %1379 = vmatprep.subr.bf16.mxu0 %v1577_v1  ;;  %325 = vst [vmem:[#allocation2] sm:$0xf] %v324_v29  ;;  %1433 = vmatprep.subr.bf16.mxu1 %v1577_v1 }
  0x19   : > { %329 = vst [vmem:[#allocation2 + $0x8] sm:$0x1] %v328_v31 }
  0x1b   : > { %1380 = vmatpush3.bf16.msra.mxu0 %v1520_v27  ;;  %1434 = vmatpush3.bf16.msra.mxu1 %v1544_v11  ;;  %v1564_v11 = vld [vmem:[%s1909_s4 + $0xa0] sm:$0xff]  }
  0x1c   : > { %1381 = vmatprep.subr.bf16.mxu0 %v1577_v1  ;;  %1435 = vmatprep.subr.bf16.mxu1 %v1577_v1 }
  0x1f   : > { %v331_v33 = vld [vmem:[#allocation2 + $0x4] sm:$0xf]  ;;  %1382 = vmatpush3.bf16.msra.mxu0 %v1521_v32  ;;  %v330_v35 = vld [vmem:[#allocation2] sm:$0xf]  ;;  %1436 = vmatpush3.bf16.msra.mxu1 %v1545_v12  ;;  %v1565_v12 = vld [vmem:[%s1909_s4 + $0xa8] sm:$0xff]  }
  0x20   : > { %1383 = vmatprep.subr.bf16.mxu0 %v1577_v1  ;;  %v1197_v36 = vcombine.low %v330_v35, %v331_v33  ;;  %v1524_v37 = vld [vmem:[#allocation2 + $0x8] ss:$0 sps:$4 sm:$0x11]   ;;  %v567_v38 = vld [vmem:[#allocation2] sm:$0xe]  ;;  %1437 = vmatprep.subr.bf16.mxu1 %v1577_v1 }
  0x21   : > { %v383_v41 = vshll.u32 %v1524_v37, 16  ;;  %v1231_v42 = vcombine.low %v567_v38, %v331_v33  ;;  %v590_v44 = vrot.slane %v1524_v37, 1 }
  0x22   : > { %v376_v39 = vshrl.u32 %v1197_v36, 16  ;;  %v378_v40 = vshll.u32 %v1197_v36, 16 }
  0x23   : > { %1384 = vmatpush3.bf16.msra.mxu0 %v1522_v34  ;;  %v385_v47 = vrot.slane %v383_v41, 1  ;;  %v589_v49 = vrot.slane %v1231_v42, 1  ;;  %1438 = vmatpush3.bf16.msra.mxu1 %v1546_v10  ;;  %v1566_v10 = vld [vmem:[%s1909_s4 + $0xb0] sm:$0xff]  }
  0x24   : > { %1389 = vmatprep.subr.bf16.mxu0 %v1577_v1  ;;  %v380_v46 = vrot.slane %v378_v40, 1  ;;  %1439 = vmatprep.subr.bf16.mxu1 %v1577_v1  ;;  %v734_v40 = vld [vmem:[#allocation3 + $0x8] sm:$0x1] }
  0x25   : > { %v591_v51 = vsel %vm588_vm11, %v589_v49, %v590_v44 }
  0x26   : > { %v381_v50 = vor.u32 %v380_v46, %v376_v39 }
  0x27   : > { %1440 = vmatpush3.bf16.msra.mxu1 %v1547_v13  ;;  %v1567_v13 = vld [vmem:[%s1909_s4 + $0xb8] sm:$0xff]  }
  0x28   : > { %v386_v52 = vsel %vm374_vm10, %v381_v50, %v385_v47  ;;  %1441 = vmatprep.subr.bf16.mxu1 %v1577_v1 }
  0x29   : > { %1386 = vmatmul.mubr.bf16.vlgmr.msra.gmra.mrb[0].mxu0 %v386_v52 }
  0x2a   : > { %1390 = vmatpush3.bf16.msra.mxu0 %v1525_v48  ;;  %1405 = vmatprep.mubr.msk.bf16.mxu0 %vm1578_vm0, %v1577_v1 }
  0x2b   : > { %1391 = vmatprep.subr.bf16.mxu0 %v1577_v1  ;;  %1442 = vmatpush3.bf16.msra.mxu1 %v1548_v14  ;;  %v1303_v14 = vld [vmem:[%s1910_s5] ss:$0 sm:$0xff] }
  0x2c   : > { %1443 = vmatprep.subr.bf16.mxu1 %v1577_v1 }
  0x2e   : > { %1392 = vmatpush3.bf16.msra.mxu0 %v1526_v53 }
  0x2f   : > { %1393 = vmatprep.subr.bf16.mxu0 %v1577_v1  ;;  %1444 = vmatpush3.bf16.msra.mxu1 %v1549_v15  ;;  %v1312_v15 = vld [vmem:[%s1650_s12] sm:$0xff]   ;;  %s278_s12 = scalar_lea.vmem %s1912_s7, %s1308_s10 }
  0x30   : > { %1449 = vmatprep.subr.bf16.mxu1 %v1577_v1 }
  0x32   : > { %1394 = vmatpush3.bf16.msra.mxu0 %v1527_v54 }
  0x33   : > { %1395 = vmatprep.subr.bf16.mxu0 %v1577_v1 }
  0x36   : > { %1396 = vmatpush3.bf16.msra.mxu0 %v1528_v55 }
  0x37   : > { %1397 = vmatprep.subr.bf16.mxu0 %v1577_v1 }
  0x3a   : > { %1398 = vmatpush3.bf16.msra.mxu0 %v1529_v56 }
  0x3b   : > { %1399 = vmatprep.subr.bf16.mxu0 %v1577_v1 }
  0x3e   : > { %1400 = vmatpush3.bf16.msra.mxu0 %v1530_v57 }
  0x3f   : > { %1401 = vmatprep.subr.bf16.mxu0 %v1577_v1 }
  0x42   : > { %1402 = vmatpush3.bf16.msra.mxu0 %v1531_v58 }
  0x43   : > { %1403 = vmatprep.subr.bf16.mxu0 %v1577_v1 }
  0x46   : > { %1404 = vmatpush3.bf16.msra.mxu0 %v1532_v59 }
  0x47   : > { %1409 = vmatprep.subr.bf16.mxu0 %v1577_v1 }
  0x49   : > { %1406 = vmatmul.mubr.bf16.vlgmr.msra.gmra.mrb[0].mxu0 %v1197_v36  ;;  %v730_v36 = vld [vmem:[#allocation3] sm:$0xf] }
  0x4a   : > { %1410 = vmatpush3.bf16.msra.mxu0 %v1533_v60  ;;  %1425 = vmatprep.mubr.msk.bf16.mxu0 %vm1578_vm0, %v1577_v1 }
  0x4b   : > { %1411 = vmatprep.subr.bf16.mxu0 %v1577_v1 }
  0x4e   : > { %1412 = vmatpush3.bf16.msra.mxu0 %v1534_v61  ;;  %v1553_v61 = vld [vmem:[%s1909_s4 + $0x8] sm:$0xff]  }
  0x4f   : > { %1413 = vmatprep.subr.bf16.mxu0 %v1577_v1 }
  0x52   : > { %1414 = vmatpush3.bf16.msra.mxu0 %v1535_v62  ;;  %v1554_v62 = vld [vmem:[%s1909_s4 + $0x10] sm:$0xff]  }
  0x53   : > { %1415 = vmatprep.subr.bf16.mxu0 %v1577_v1 }
  0x56   : > { %1416 = vmatpush3.bf16.msra.mxu0 %v1536_v63  ;;  %v1555_v63 = vld [vmem:[%s1909_s4 + $0x18] sm:$0xff]  }
  0x57   : > { %1417 = vmatprep.subr.bf16.mxu0 %v1577_v1 }
  0x5a   : > { %1418 = vmatpush3.bf16.msra.mxu0 %v1537_v0  ;;  %v1556_v0 = vld [vmem:[%s1909_s4 + $0x20] sm:$0xff]  }
  0x5b   : > { %1419 = vmatprep.subr.bf16.mxu0 %v1577_v1 }
  0x5e   : > { %1420 = vmatpush3.bf16.msra.mxu0 %v1538_v2  ;;  %v1557_v2 = vld [vmem:[%s1909_s4 + $0x28] sm:$0xff]  }
  0x5f   : > { %1421 = vmatprep.subr.bf16.mxu0 %v1577_v1 }
  0x62   : > { %1422 = vmatpush3.bf16.msra.mxu0 %v1539_v3  ;;  %v1558_v3 = vld [vmem:[%s1909_s4 + $0x30] sm:$0xff]  }
  0x63   : > { %1423 = vmatprep.subr.bf16.mxu0 %v1577_v1 }
  0x66   : > { %1424 = vmatpush3.bf16.msra.mxu0 %v1540_v4  ;;  %v1559_v4 = vld [vmem:[%s1909_s4 + $0x38] sm:$0xff]  }
  0x69   : > { %1426 = vmatmul.mubr.bf16.vlgmr.msra.gmra.mrb[0].mxu0 %v591_v51 }
 0x13c   : > { %v675_v17 = vpop.f32.mrb[0].mxu0 }
 0x13d   : > { %v691_v19 = vmul.f32 %v1240_v16, %v675_v17  ;;  %v1427_v21 = vpop.f32.mrb[1].mxu0  ;;  %v1304_v17 = vld [vmem:[%s1911_s6] ss:$0 sm:$0xff] }
 0x13e   : > { %v678_v22 = vpop.f32.mrb[2].mxu0 }
 0x13f   : > { %v700_v23 = vadd.f32 %v1241_v18, %v691_v19  ;;  %v692_v24 = vmul.f32 %v1240_v16, %v678_v22  ;;  %v1428_v26 = vpop.f32.mrb[3].mxu0  ;;  %v1313_v19 = vunpack.c.l.bf16 %v1312_v15 }
 0x141   : > { %v702_v27 = vmax.f32 %v700_v23, 0.0  ;;  %v701_v28 = vadd.f32 %v1241_v18, %v692_v24 }
 0x143   : > { %v1309_v29 = vpack.c.bf16 %v702_v27, %v702_v27  ;;  %v703_v30 = vmax.f32 %v701_v28, 0.0 }
 0x145   : > { %v711_v31 = vshrl.u32 %v1309_v29, 16  ;;  %v1310_v32 = vpack.c.bf16 %v703_v30, %v703_v30  ;;  %v714_v34 = vshll.u32 %v1309_v29, 16 }
 0x147   : > { %v713_v33 = vrot.slane %v711_v31, 7  ;;  %v719_v35 = vshrl.u32 %v1310_v32, 16  ;;  %v722_v39 = vshll.u32 %v1310_v32, 16 }
 0x149   : > { %v716_v37 = vor.u32 %v714_v34, %v713_v33  ;;  %v721_v38 = vrot.slane %v719_v35, 7  ;;  %v717_v41 = vrot.slane %v713_v33, 4 }
 0x14b   : > { %v731_v42 = vsel %vm1682_vm9, %v716_v37, %v730_v36  ;;  %v724_v43 = vor.u32 %v722_v39, %v721_v38  ;;  %v726_v44 = vrot.slane %v721_v38, 4 }
 0x14c   : > { %732 = vst [vmem:[#allocation3] sm:$0xf] %v731_v42 }
 0x14d   : > { %v725_v45 = vsel %vm1676_vm8, %v717_v41, %v724_v43  ;;  %v735_v46 = vsel %vm1656_vm4, %v726_v44, %v734_v40 }
 0x14e   : > { %733 = vst [vmem:[#allocation3 + $0x4] sm:$0xf] %v725_v45  ;;  %736 = vst [vmem:[#allocation3 + $0x8] sm:$0x1] %v735_v46 }
 0x153   : > { %v737_v47 = vld [vmem:[#allocation3] sm:$0xf] }
 0x154   : > { %v973_v49 = vld [vmem:[#allocation3] sm:$0xe] }
 0x155   : > { %v738_v48 = vld [vmem:[#allocation3 + $0x4] sm:$0xf]  ;;  %v1551_v51 = vld [vmem:[#allocation3 + $0x8] ss:$0 sps:$4 sm:$0x11]  }
 0x156   : > { %v1260_v50 = vcombine.low %v737_v47, %v738_v48  ;;  %v1294_v52 = vcombine.low %v973_v49, %v738_v48  ;;  %v789_v25 = vshll.u32 %v1551_v51, 16  ;;  %v995_v55 = vrot.slane %v1551_v51, 1 }
 0x158   : > { %v784_v53 = vshll.u32 %v1260_v50, 16  ;;  %v994_v54 = vrot.slane %v1294_v52, 1  ;;  %v782_v56 = vshrl.u32 %v1260_v50, 16  ;;  %v791_v59 = vrot.slane %v789_v25, 1 }
 0x15a   : > { %v786_v57 = vrot.slane %v784_v53, 1  ;;  %v996_v20 = vsel %vm588_vm11, %v994_v54, %v995_v55 }
 0x15c   : > { %v787_v58 = vor.u32 %v786_v57, %v782_v56 }
 0x15e   : > { %v792_v60 = vsel %vm374_vm10, %v787_v58, %v791_v59 }
 0x15f   : > { %1446 = vmatmul.mubr.bf16.vlgmr.msra.gmra.mrb[0].mxu1 %v792_v60 }
 0x160   : > { %1450 = vmatpush3.bf16.msra.mxu1 %v1552_v6  ;;  %1465 = vmatprep.mubr.msk.bf16.mxu1 %vm1578_vm0, %v1577_v1 }
 0x161   : > { %1451 = vmatprep.subr.bf16.mxu1 %v1577_v1 }
 0x164   : > { %1452 = vmatpush3.bf16.msra.mxu1 %v1553_v61 }
 0x165   : > { %1453 = vmatprep.subr.bf16.mxu1 %v1577_v1 }
 0x168   : > { %1454 = vmatpush3.bf16.msra.mxu1 %v1554_v62 }
 0x169   : > { %1455 = vmatprep.subr.bf16.mxu1 %v1577_v1 }
 0x16c   : > { %1456 = vmatpush3.bf16.msra.mxu1 %v1555_v63 }
 0x16d   : > { %1457 = vmatprep.subr.bf16.mxu1 %v1577_v1 }
 0x170   : > { %1458 = vmatpush3.bf16.msra.mxu1 %v1556_v0 }
 0x171   : > { %1459 = vmatprep.subr.bf16.mxu1 %v1577_v1 }
 0x174   : > { %1460 = vmatpush3.bf16.msra.mxu1 %v1557_v2 }
 0x175   : > { %1461 = vmatprep.subr.bf16.mxu1 %v1577_v1 }
 0x178   : > { %1462 = vmatpush3.bf16.msra.mxu1 %v1558_v3 }
 0x179   : > { %1463 = vmatprep.subr.bf16.mxu1 %v1577_v1 }
 0x17c   : > { %1464 = vmatpush3.bf16.msra.mxu1 %v1559_v4 }
 0x17d   : > { %1469 = vmatprep.subr.bf16.mxu1 %v1577_v1 }
 0x17f   : > { %1466 = vmatmul.mubr.bf16.vlgmr.msra.gmra.mrb[0].mxu1 %v1260_v50 }
 0x180   : > { %1470 = vmatpush3.bf16.msra.mxu1 %v1560_v5  ;;  %1485 = vmatprep.mubr.msk.bf16.mxu1 %vm1578_vm0, %v1577_v1 }
 0x181   : > { %1471 = vmatprep.subr.bf16.mxu1 %v1577_v1 }
 0x184   : > { %1472 = vmatpush3.bf16.msra.mxu1 %v1561_v7 }
 0x185   : > { %1473 = vmatprep.subr.bf16.mxu1 %v1577_v1 }
 0x188   : > { %1474 = vmatpush3.bf16.msra.mxu1 %v1562_v8 }
 0x189   : > { %1475 = vmatprep.subr.bf16.mxu1 %v1577_v1 }
 0x18c   : > { %1476 = vmatpush3.bf16.msra.mxu1 %v1563_v9 }
 0x18d   : > { %1477 = vmatprep.subr.bf16.mxu1 %v1577_v1 }
 0x190   : > { %1478 = vmatpush3.bf16.msra.mxu1 %v1564_v11 }
 0x191   : > { %1479 = vmatprep.subr.bf16.mxu1 %v1577_v1 }
 0x194   : > { %1480 = vmatpush3.bf16.msra.mxu1 %v1565_v12 }
 0x195   : > { %1481 = vmatprep.subr.bf16.mxu1 %v1577_v1 }
 0x198   : > { %1482 = vmatpush3.bf16.msra.mxu1 %v1566_v10 }
 0x199   : > { %1483 = vmatprep.subr.bf16.mxu1 %v1577_v1  ;;  %v1314_v1 = vunpack.c.h.bf16 %v1312_v15 }
 0x19c   : > { %1484 = vmatpush3.bf16.msra.mxu1 %v1567_v13 }
 0x19f   : > { %1486 = vmatmul.mubr.bf16.vlgmr.msra.gmra.mrb[0].mxu1 %v996_v20 }
 0x272   : > { %v1080_v16 = vpop.f32.mrb[0].mxu1 }
 0x273   : > { %v1096_v18 = vmul.f32 %v1303_v14, %v1080_v16  ;;  %v1487_v21 = vpop.f32.mrb[1].mxu1 }
 0x274   : > { %v1083_v22 = vpop.f32.mrb[2].mxu1 }
 0x275   : > { %v1105_v23 = vadd.f32 %v1304_v17, %v1096_v18  ;;  %v1097_v24 = vmul.f32 %v1303_v14, %v1083_v22  ;;  %v1488_v26 = vpop.f32.mrb[3].mxu1 }
 0x277   : > { %v1111_v27 = vadd.f32 %v1313_v19, %v1105_v23  ;;  %v1106_v28 = vadd.f32 %v1304_v17, %v1097_v24 }
 0x279   : > { %v1113_v29 = vmax.f32 %v1111_v27, 0.0  ;;  %v1112_v30 = vadd.f32 %v1314_v1, %v1106_v28 }
 0x27b   : > { %1115 = vst [vmem:[%s278_s12] sm:$0xff] %v1113_v29  ;;  %v1114_v31 = vmax.f32 %v1112_v30, 0.0 }
 0x27d   : > { %1116 = vst [vmem:[%s278_s12 + $0x8] sm:$0xff] %v1114_v31 }
 0x27e PF: > { %s17_s24 = sadd.s32 1, %s1575_s24  }
 0x27f   : > { %p14_p4 = scmp.ge.s32.totalorder %s17_s24, 6  }
 0x281   :  { %16 = sbr.rel (!%p14_p4) target bundleno = 1 (0x1), region = 82 }

</bundles_post_ra>
